<compile_context>
chip_gen: v6e
topology: v6e:2x2x1
jax: 0.10.0
libtpu: 0.0.40
codegen_flags: <defaults>
</compile_context>

<pallas_src>
import math

import jax
import jax.numpy as jnp
from jax import lax
from jax.experimental import pallas as pl
from jax.experimental.pallas import tpu as pltpu


def _sdpa_kernel(q_ref, k_ref, v_ref, mask_ref, o_ref, m_i, l_i, acc):
    """One (batch, q-tile, k-tile) grid step of flash-style attention."""
    ki = pl.program_id(2)

    @pl.when(ki == 0)
    def _init():
        m_i[...] = jnp.full_like(m_i, -jnp.inf)
        l_i[...] = jnp.zeros_like(l_i)
        acc[...] = jnp.zeros_like(acc)

    d_k = q_ref.shape[-1]
    inv_sqrt_dk = 1.0 / math.sqrt(d_k)

    # Fold the scale into q (tq*Dk multiplies instead of tq*tk).
    q = q_ref[0] * jnp.asarray(inv_sqrt_dk, dtype=q_ref.dtype)   # (tq, Dk)
    k = k_ref[0]                                                 # (tk, Dk)
    v = v_ref[0]                                                 # (tk, Dv)

    # q @ k^T without materializing a transpose: contract Dk of both operands.
    scores = lax.dot_general(
        q, k, (((1,), (1,)), ((), ())),
        preferred_element_type=jnp.float32)                      # (tq, tk) f32

    # Multiplicative mask (module semantics), softmax math in f32.
    masked = scores * mask_ref[0].astype(jnp.float32)

    # Online softmax update.
    m_prev = m_i[...]
    m_new = jnp.maximum(m_prev, jnp.max(masked, axis=-1, keepdims=True))
    alpha = jnp.exp(m_prev - m_new)
    p = jnp.exp(masked - m_new)                                  # (tq, tk) f32
    l_i[...] = alpha * l_i[...] + jnp.sum(p, axis=-1, keepdims=True)
    acc[...] = alpha * acc[...] + jnp.dot(
        p.astype(v.dtype), v, preferred_element_type=jnp.float32)
    m_i[...] = m_new

    @pl.when(ki == pl.num_programs(2) - 1)
    def _finalize():
        # Exact reciprocal here: runs once per q-tile, negligible cost, keeps the
        # result bit-tight against the reference softmax.
        o_ref[0] = (acc[...] * pl.reciprocal(l_i[...])).astype(o_ref.dtype)


def _pick_tile(n, pref):
    """Largest power-of-two divisor of n that is <= pref (or n itself if small)."""
    if n <= pref:
        return n
    t = pref
    while t > 1 and n % t != 0:
        t //= 2
    return max(t, 1)


def scaled_dot_product_attention(q, k, v, mask, *, tq=256, tk=256):
    """q:(B,Sq,Dk)  k:(B,Sk,Dk)  v:(B,Sk,Dv)  mask:(B,Sq,Sk) -> (B,Sq,Dv)"""
    B, Sq, Dk = q.shape
    _, Sk, _ = k.shape
    Dv = v.shape[-1]

    tq = _pick_tile(Sq, tq)
    tk = _pick_tile(Sk, tk)
    grid = (B, Sq // tq, Sk // tk)

    return pl.pallas_call(
        _sdpa_kernel,
        out_shape=jax.ShapeDtypeStruct((B, Sq, Dv), q.dtype),
        grid_spec=pltpu.PrefetchScalarGridSpec(
            num_scalar_prefetch=0,
            grid=grid,
            in_specs=[
                pl.BlockSpec((1, tq, Dk), lambda b, qi, ki: (b, qi, 0)),   # q
                pl.BlockSpec((1, tk, Dk), lambda b, qi, ki: (b, ki, 0)),   # k
                pl.BlockSpec((1, tk, Dv), lambda b, qi, ki: (b, ki, 0)),   # v
                pl.BlockSpec((1, tq, tk), lambda b, qi, ki: (b, qi, ki)),  # mask
            ],
            out_specs=pl.BlockSpec((1, tq, Dv), lambda b, qi, ki: (b, qi, 0)),
            scratch_shapes=[
                pltpu.VMEM((tq, 1), jnp.float32),   # running max  m_i
                pltpu.VMEM((tq, 1), jnp.float32),   # running sum  l_i
                pltpu.VMEM((tq, Dv), jnp.float32),  # accumulator
            ],
        ),
        compiler_params=pltpu.CompilerParams(
            dimension_semantics=("parallel", "parallel", "arbitrary"),
        ),
    )(q, k, v, mask)


def _reference(q, k, v, mask):
    d_k = q.shape[-1]
    scores = jnp.einsum("bqd,bkd->bqk", q, k) / math.sqrt(d_k)
    masked = scores * mask
    probs = jax.nn.softmax(masked, axis=-1)
    return jnp.einsum("bqk,bkd->bqd", probs, v)


if __name__ == "__main__":
    # Small deterministic example: batch=2, seq=8, d_k=d_v=32
    B, Sq, Sk, Dk, Dv = 2, 8, 8, 32, 32
    key = jax.random.PRNGKey(0)
    kq, kk, kv, km = jax.random.split(key, 4)

    q = jax.random.normal(kq, (B, Sq, Dk), dtype=jnp.float32)
    k = jax.random.normal(kk, (B, Sk, Dk), dtype=jnp.float32)
    v = jax.random.normal(kv, (B, Sk, Dv), dtype=jnp.float32)
    # 0/1 multiplicative mask (as passed to the PyTorch module's forward)
    mask = (jax.random.uniform(km, (B, Sq, Sk)) > 0.2).astype(jnp.float32)

    out = scaled_dot_product_attention(q, k, v, mask)
    jax.block_until_ready(out)

    ref = _reference(q, k, v, mask)
    assert out.shape == (B, Sq, Dv)
    assert jnp.allclose(out, ref, atol=1e-5, rtol=1e-5), "mismatch vs reference"

    print("KERNEL_OK")
</pallas_src>

<mosaic_0001>
module attributes {stable_mosaic.version = 11 : i64} {
  func.func @_sdpa_kernel(%arg0: i32, %arg1: i32, %arg2: i32, %arg3: memref<1x8x32xf32, #tpu.memory_space<vmem>>, %arg4: memref<1x8x32xf32, #tpu.memory_space<vmem>>, %arg5: memref<1x8x32xf32, #tpu.memory_space<vmem>>, %arg6: memref<1x8x8xf32, #tpu.memory_space<vmem>>, %arg7: memref<1x8x32xf32, #tpu.memory_space<vmem>>, %arg8: memref<8x1xf32, #tpu.memory_space<vmem>>, %arg9: memref<8x1xf32, #tpu.memory_space<vmem>>, %arg10: memref<8x32xf32, #tpu.memory_space<vmem>>) attributes {dimension_semantics = [#tpu.dimension_semantics<parallel>, #tpu.dimension_semantics<parallel>, #tpu.dimension_semantics<arbitrary>], iteration_bounds = array<i64: 2, 1, 1>, scalar_prefetch = 0 : i64, scratch_operands = 3 : i64, tpu.core_type = #tpu.core_type<tc>, window_params = [{transform_indices = @transform_0, window_bounds = array<i64: 1, 8, 32>}, {transform_indices = @transform_1, window_bounds = array<i64: 1, 8, 32>}, {transform_indices = @transform_2, window_bounds = array<i64: 1, 8, 32>}, {transform_indices = @transform_3, window_bounds = array<i64: 1, 8, 8>}, {transform_indices = @transform_4, window_bounds = array<i64: 1, 8, 32>}]} {
    %c0_i32 = arith.constant 0 : i32
    %0 = arith.cmpi eq, %arg2, %c0_i32 : i32
    %1 = arith.extui %0 : i1 to i32
    %c0_i32_0 = arith.constant 0 : i32
    %2 = arith.cmpi ne, %1, %c0_i32_0 : i32
    scf.if %2 {
      %cst_30 = arith.constant 0xFF800000 : f32
      %40 = vector.broadcast %cst_30 : f32 to vector<8x1xf32>
      %c0_31 = arith.constant 0 : index
      %c0_32 = arith.constant 0 : index
      %41 = vector.load %arg8[%c0_31, %c0_32] : memref<8x1xf32, #tpu.memory_space<vmem>>, vector<8x1xf32>
      tpu.vector_store %arg8[%c0_31, %c0_32], %40 {strides = array<i32>} : memref<8x1xf32, #tpu.memory_space<vmem>>, vector<8x1xf32>,
      %cst_33 = arith.constant 0.000000e+00 : f32
      %42 = vector.broadcast %cst_33 : f32 to vector<8x1xf32>
      %c0_34 = arith.constant 0 : index
      %c0_35 = arith.constant 0 : index
      %43 = vector.load %arg9[%c0_34, %c0_35] : memref<8x1xf32, #tpu.memory_space<vmem>>, vector<8x1xf32>
      tpu.vector_store %arg9[%c0_34, %c0_35], %42 {strides = array<i32>} : memref<8x1xf32, #tpu.memory_space<vmem>>, vector<8x1xf32>,
      %cst_36 = arith.constant 0.000000e+00 : f32
      %44 = vector.broadcast %cst_36 : f32 to vector<8x32xf32>
      %c0_37 = arith.constant 0 : index
      %c0_38 = arith.constant 0 : index
      %45 = vector.load %arg10[%c0_37, %c0_38] : memref<8x32xf32, #tpu.memory_space<vmem>>, vector<8x32xf32>
      tpu.vector_store %arg10[%c0_37, %c0_38], %44 {strides = array<i32>} : memref<8x32xf32, #tpu.memory_space<vmem>>, vector<8x32xf32>,
    } else {
    }
    %c0 = arith.constant 0 : index
    %c0_1 = arith.constant 0 : index
    %c0_2 = arith.constant 0 : index
    %3 = vector.load %arg3[%c0, %c0_1, %c0_2] : memref<1x8x32xf32, #tpu.memory_space<vmem>>, vector<1x8x32xf32>
    %4 = vector.shape_cast %3 : vector<1x8x32xf32> to vector<8x32xf32>
    %cst = arith.constant 0.176776692 : f32
    %5 = vector.broadcast %cst : f32 to vector<8x32xf32>
    %6 = arith.mulf %4, %5 : vector<8x32xf32>
    %c0_3 = arith.constant 0 : index
    %c0_4 = arith.constant 0 : index
    %c0_5 = arith.constant 0 : index
    %7 = vector.load %arg4[%c0_3, %c0_4, %c0_5] : memref<1x8x32xf32, #tpu.memory_space<vmem>>, vector<1x8x32xf32>
    %8 = vector.shape_cast %7 : vector<1x8x32xf32> to vector<8x32xf32>
    %c0_6 = arith.constant 0 : index
    %c0_7 = arith.constant 0 : index
    %c0_8 = arith.constant 0 : index
    %9 = vector.load %arg5[%c0_6, %c0_7, %c0_8] : memref<1x8x32xf32, #tpu.memory_space<vmem>>, vector<1x8x32xf32>
    %10 = vector.shape_cast %9 : vector<1x8x32xf32> to vector<8x32xf32>
    %cst_9 = arith.constant dense<0.000000e+00> : vector<8x8xf32>
    %11 = tpu.matmul %6, %8, %cst_9 {dimension_numbers = #tpu.dot_dimension_numbers<[1], [1], [0], [0], [0, 0, 1, 0], [], []>} : vector<8x32xf32>, vector<8x32xf32>, vector<8x8xf32> -> vector<8x8xf32>
    %c0_10 = arith.constant 0 : index
    %c0_11 = arith.constant 0 : index
    %c0_12 = arith.constant 0 : index
    %12 = vector.load %arg6[%c0_10, %c0_11, %c0_12] : memref<1x8x8xf32, #tpu.memory_space<vmem>>, vector<1x8x8xf32>
    %13 = vector.shape_cast %12 : vector<1x8x8xf32> to vector<8x8xf32>
    %14 = arith.mulf %11, %13 : vector<8x8xf32>
    %c0_13 = arith.constant 0 : index
    %c0_14 = arith.constant 0 : index
    %15 = vector.load %arg8[%c0_13, %c0_14] : memref<8x1xf32, #tpu.memory_space<vmem>>, vector<8x1xf32>
    %cst_15 = arith.constant dense<0xFF800000> : vector<8xf32>
    %16 = vector.multi_reduction <maximumf>, %14, %cst_15 [1] : vector<8x8xf32> to vector<8xf32>
    %17 = vector.shape_cast %16 : vector<8xf32> to vector<8x1xf32>
    %18 = arith.maximumf %15, %17 : vector<8x1xf32>
    %19 = arith.subf %15, %18 : vector<8x1xf32>
    %20 = math.exp %19 : vector<8x1xf32>
    %21 = vector.broadcast %18 : vector<8x1xf32> to vector<8x8xf32>
    %22 = arith.subf %14, %21 : vector<8x8xf32>
    %23 = math.exp %22 : vector<8x8xf32>
    %c0_16 = arith.constant 0 : index
    %c0_17 = arith.constant 0 : index
    %24 = vector.load %arg9[%c0_16, %c0_17] : memref<8x1xf32, #tpu.memory_space<vmem>>, vector<8x1xf32>
    %25 = arith.mulf %20, %24 : vector<8x1xf32>
    %cst_18 = arith.constant dense<0.000000e+00> : vector<8xf32>
    %26 = vector.multi_reduction <add>, %23, %cst_18 [1] : vector<8x8xf32> to vector<8xf32>
    %27 = vector.shape_cast %26 : vector<8xf32> to vector<8x1xf32>
    %28 = arith.addf %25, %27 : vector<8x1xf32>
    %c0_19 = arith.constant 0 : index
    %c0_20 = arith.constant 0 : index
    %29 = vector.load %arg9[%c0_19, %c0_20] : memref<8x1xf32, #tpu.memory_space<vmem>>, vector<8x1xf32>
    tpu.vector_store %arg9[%c0_19, %c0_20], %28 {strides = array<i32>} : memref<8x1xf32, #tpu.memory_space<vmem>>, vector<8x1xf32>,
    %c0_21 = arith.constant 0 : index
    %c0_22 = arith.constant 0 : index
    %30 = vector.load %arg10[%c0_21, %c0_22] : memref<8x32xf32, #tpu.memory_space<vmem>>, vector<8x32xf32>
    %31 = vector.broadcast %20 : vector<8x1xf32> to vector<8x32xf32>
    %32 = arith.mulf %31, %30 : vector<8x32xf32>
    %cst_23 = arith.constant dense<0.000000e+00> : vector<8x32xf32>
    %33 = tpu.matmul %23, %10, %cst_23 {dimension_numbers = #tpu.dot_dimension_numbers<[1], [0], [0], [1], [0, 0, 1, 1], [], []>} : vector<8x8xf32>, vector<8x32xf32>, vector<8x32xf32> -> vector<8x32xf32>
    %34 = arith.addf %32, %33 : vector<8x32xf32>
    %c0_24 = arith.constant 0 : index
    %c0_25 = arith.constant 0 : index
    %35 = vector.load %arg10[%c0_24, %c0_25] : memref<8x32xf32, #tpu.memory_space<vmem>>, vector<8x32xf32>
    tpu.vector_store %arg10[%c0_24, %c0_25], %34 {strides = array<i32>} : memref<8x32xf32, #tpu.memory_space<vmem>>, vector<8x32xf32>,
    %c0_26 = arith.constant 0 : index
    %c0_27 = arith.constant 0 : index
    %36 = vector.load %arg8[%c0_26, %c0_27] : memref<8x1xf32, #tpu.memory_space<vmem>>, vector<8x1xf32>
    tpu.vector_store %arg8[%c0_26, %c0_27], %18 {strides = array<i32>} : memref<8x1xf32, #tpu.memory_space<vmem>>, vector<8x1xf32>,
    %c0_i32_28 = arith.constant 0 : i32
    %37 = arith.cmpi eq, %arg2, %c0_i32_28 : i32
    %38 = arith.extui %37 : i1 to i32
    %c0_i32_29 = arith.constant 0 : i32
    %39 = arith.cmpi ne, %38, %c0_i32_29 : i32
    scf.if %39 {
      %c0_30 = arith.constant 0 : index
      %c0_31 = arith.constant 0 : index
      %40 = vector.load %arg10[%c0_30, %c0_31] : memref<8x32xf32, #tpu.memory_space<vmem>>, vector<8x32xf32>
      %c0_32 = arith.constant 0 : index
      %c0_33 = arith.constant 0 : index
      %41 = vector.load %arg9[%c0_32, %c0_33] : memref<8x1xf32, #tpu.memory_space<vmem>>, vector<8x1xf32>
      %42 = tpu.reciprocal %41 : vector<8x1xf32> -> vector<8x1xf32>
      %43 = vector.broadcast %42 : vector<8x1xf32> to vector<8x32xf32>
      %44 = arith.mulf %40, %43 : vector<8x32xf32>
      %c0_34 = arith.constant 0 : index
      %c0_35 = arith.constant 0 : index
      %c0_36 = arith.constant 0 : index
      %45 = vector.load %arg7[%c0_34, %c0_35, %c0_36] : memref<1x8x32xf32, #tpu.memory_space<vmem>>, vector<1x8x32xf32>
      %46 = vector.shape_cast %45 : vector<1x8x32xf32> to vector<8x32xf32>
      %47 = vector.shape_cast %44 : vector<8x32xf32> to vector<1x8x32xf32>
      tpu.vector_store %arg7[%c0_34, %c0_35, %c0_36], %47 {strides = array<i32>} : memref<1x8x32xf32, #tpu.memory_space<vmem>>, vector<1x8x32xf32>,
    } else {
    }
    return
  }
  func.func @transform_0(%arg0: i32, %arg1: i32, %arg2: i32) -> (i32, i32, i32) {
    %c0_i32 = arith.constant 0 : i32
    %c0_i32_0 = arith.constant 0 : i32
    return %arg0, %arg1, %c0_i32 : i32, i32, i32
  }
  func.func @transform_1(%arg0: i32, %arg1: i32, %arg2: i32) -> (i32, i32, i32) {
    %c0_i32 = arith.constant 0 : i32
    %c0_i32_0 = arith.constant 0 : i32
    return %arg0, %arg2, %c0_i32 : i32, i32, i32
  }
  func.func @transform_2(%arg0: i32, %arg1: i32, %arg2: i32) -> (i32, i32, i32) {
    %c0_i32 = arith.constant 0 : i32
    %c0_i32_0 = arith.constant 0 : i32
    return %arg0, %arg2, %c0_i32 : i32, i32, i32
  }
  func.func @transform_3(%arg0: i32, %arg1: i32, %arg2: i32) -> (i32, i32, i32) {
    %c0_i32 = arith.constant 0 : i32
    return %arg0, %arg1, %arg2 : i32, i32, i32
  }
  func.func @transform_4(%arg0: i32, %arg1: i32, %arg2: i32) -> (i32, i32, i32) {
    %c0_i32 = arith.constant 0 : i32
    %c0_i32_0 = arith.constant 0 : i32
    return %arg0, %arg1, %c0_i32 : i32, i32, i32
  }
}

</mosaic_0001>

<bundles_post_ra>
// kernel: tpu_custom_call.1
= control target key start
LH: loop header
LB: loop body
LE: loop exit
PB: predicated region body
PF: predicated region fallthrough
CT: control target
= control target key end

     0   :  { %s1331_s0 = inlined_call_operand.hbm [shape: f32[2,8,32], index: 0, kind: input, shape index: {}]   ;;  %s1332_s1 = inlined_call_operand.hbm [shape: f32[2,8,32], index: 1, kind: input, shape index: {}]   ;;  %s1333_s2 = inlined_call_operand.hbm [shape: f32[2,8,32], index: 2, kind: input, shape index: {}]   ;;  %s1334_s3 = inlined_call_operand.hbm [shape: f32[2,8,8], index: 3, kind: input, shape index: {}]   ;;  %s1335_s4 = inlined_call_operand.hbm [shape: f32[2,8,32], index: 4, kind: output, shape index: {}]  }
   0x1   :  { %1339 = sst [smem:[#allocation22_spill]] %s1332_s1 }
   0x2   :  { %9 = vsyncpa [#allocation6], 0 }
   0x3   :  { %11 = vsyncpa [#allocation6 + $0x1], 0 }
   0x4   :  { %12 = vsyncpa [#allocation9], 0 }
   0x5   :  { %14 = vsyncpa [#allocation9 + $0x1], 0 }
   0x6   :  { %15 = vsyncpa [#allocation12], 0 }
   0x7   :  { %17 = vsyncpa [#allocation12 + $0x1], 0 }
   0x8   :  { %18 = vsyncpa [#allocation7], 0 }
   0x9   :  { %20 = vsyncpa [#allocation7 + $0x1], 0  ;;  %s1102_s15 = smov 0   ;;  %s1104_s16 = smov 0  }
   0xa   :  { %s1106_s17 = smov 0   ;;  %s1108_s18 = smov 0  }
   0xb   :  { %s1110_s19 = smov 0   ;;  %s1112_s20 = smov 0  }
   0xc LB: > { %1340 = sst [smem:[#allocation18_spill]] %s1054_s17  ;;  %s1133_s21 = sadd.s32 4294967295, %s1066_s20   ;;  %s1066_s20 = sphi %s1112_s20, %s26_s20   ;;  %s1062_s19 = sphi %s1110_s19, %s1355_s19   ;;  %s1058_s18 = sphi %s1108_s18, %s1354_s18   ;;  %s1054_s17 = sphi %s1106_s17, %s1353_s17   ;;  %s1050_s16 = sphi %s1104_s16, %s1357_s16   ;;  %s1046_s15 = sphi %s1102_s15, %s1356_s15  }
   0xd   : > { %1341 = sst [smem:[#allocation19_spill]] %s1062_s19  ;;  %s739_s22 = sadd.s32 4294967294, %s1066_s20  }
   0xe   : > { %s45_s23 = sadd.s32 1, %s1062_s19  ;;  %s54_s24 = sadd.s32 1, %s1054_s17 }
   0xf   : > { %p47_p0 = scmp.ge.s32.totalorder %s45_s23, 2  ;;  %p61_p1 = scmp.ne.s32.totalorder %s1054_s17, %s1050_s16 }
  0x10   : > { %p62_p2 = scmp.eq.s32.totalorder %s1066_s20, 0  ;;  %p67_p3 = scmp.ne.s32.totalorder %s1050_s16, %s1046_s15 }
  0x11   : > { %s1359_s23 = smov (%p47_p0, %s45_s23), 0  ;;  %p68_p5 = scmp.eq.s32.totalorder %s1133_s21, 0 }
  0x12   : > { %1342 = sst [smem:[#allocation20_spill]] %s1359_s23  ;;  %p1145_p4 = por %p62_p2, %p61_p1 }
  0x13   : > { %s49_s26 = ssub.s32 %s1062_s19, %s1359_s23  ;;  %p179_p6 = scmp.eq.s32.totalorder %s1133_s21, 1 }
  0x14   : > { %p52_p7 = scmp.eq.s32.totalorder %s49_s26, 0  ;;  %p1153_p8 = por %p68_p5, %p67_p3 }
  0x15   : > { %p1157_p9 = por %p179_p6, %p61_p1  ;;  %p185_p10 = scmp.eq.s32.totalorder %s739_s22, 1 }
  0x16   : > { %s1162_s29 = scalar_select %p52_p7, %s1054_s17, %s54_s24  }
  0x17   : > { %p1164_p11 = por %p185_p10, %p67_p3  ;;  %p804_p13 = scmp.lt.s32.totalorder %s1066_s20, 2 }
  0x18   : > { %1346 = sst [smem:[#allocation21_spill]] %s1162_s29  ;;  %s1171_s5 = sand.u32 1, %s1054_s17  }
  0x19   : > { %s1174_s6 = sshll.u32 %s1171_s5, 3  ;;  %s1177_s7 = sshll.u32 %s1062_s19, 7 }
  0x1a   : > { %p1181_p0 = pnand %p804_p13, %p1145_p4  ;;  %s224_s9 = sand.u32 1, %s1066_s20  }
  0x1b   : > { %s1349_s1 = sld [smem:[#allocation22_spill]]  ;;  %s228_s13 = scalar_lea.vmem [#allocation8], %s1174_s6 }
  0x1c   : > { %s236_s14 = sshll.u32 %s228_s13, 4  ;;  %p750_p1 = scmp.ge.s32.totalorder %s1066_s20, 1  ;;  %s237_s14 = int_to_ptr.vmem [resolvable:$true] %s236_s14 }
  0x1d   : > { %p280_p2 = scmp.lt.s32.totalorder %s1066_s20, 3  ;;  %s1193_s22 = scalar_lea.sflag [#allocation9], %s224_s9 }
  0x1e   : > { %p868_p3 = pneg %p1181_p0  ;;  %s879_s24 = scalar_lea.vmem %s237_s14, 128 }
  0x1f   : > { %p880_p4 = scmp.ne.s32.totalorder %s237_s14, %s879_s24  ;;  %s1068_s25 = smov [#allocation8]  }
  0x20   : > { %s884_s26 = sshll.u32 %s1068_s25, 4  ;;  %s885_s26 = int_to_ptr.vmem [resolvable:$false] %s884_s26 }
  0x21   : > { %s234_s12 = scalar_lea.hbm %s1349_s1, %s1177_s7  ;;  %p882_p5 = pnand %p880_p4, %p868_p3 }
  0x22   : > { %s886_s10 = scalar_lea.vmem %s885_s26, 256  ;;  %p887_p7 = scmp.lt.s32.totalorder %s237_s14, %s885_s26 }
  0x23   : > { %p883_p6 = pneg %p882_p5  ;;  %p888_p10 = scmp.lt.s32.totalorder %s886_s10, %s879_s24 }
  0x25   : > { %p889_p13 = por %p888_p10, %p887_p7 }
  0x27   : > { %p890_p12 = pnand %p889_p13, %p883_p6 }
  0x29   : > { %893 = shalt.err (!%p890_p12)
}
  0x2a   : > { %793 = dma.hbm_to_vmem [thread:$0]  (!%p1181_p0), %s234_s12, 128, %s237_s14, %s1193_s22  }
  0x2b   : > { %p1207_p4 = pnand %p750_p1, %p280_p2  ;;  %s215_s24 = scalar_lea.hbm %s1331_s0, %s1177_s7 }
  0x2c   : > { %s209_s25 = scalar_lea.vmem [#allocation5], %s1174_s6  ;;  %s253_s23 = scalar_lea.hbm %s1333_s2, %s1177_s7 }
  0x2d   : > { %s217_s26 = sshll.u32 %s209_s25, 4  ;;  %s206_s19 = scalar_lea.sflag [#allocation6], %s1171_s5  ;;  %s218_s26 = int_to_ptr.vmem [resolvable:$true] %s217_s26 }
  0x2e   : > { %s907_s29 = scalar_lea.vmem %s218_s26, 128  ;;  %s1069_s12 = smov [#allocation5]  }
  0x2f   : > { %p908_p12 = scmp.ne.s32.totalorder %s218_s26, %s907_s29  ;;  %s912_s14 = sshll.u32 %s1069_s12, 4  ;;  %s913_s14 = int_to_ptr.vmem [resolvable:$false] %s912_s14 }
  0x30   : > { %s914_s17 = scalar_lea.vmem %s913_s14, 256  ;;  %p915_p5 = scmp.lt.s32.totalorder %s218_s26, %s913_s14 }
  0x31   : > { %p910_p1 = pnand %p908_p12, %p868_p3  ;;  %p916_p6 = scmp.lt.s32.totalorder %s914_s17, %s907_s29 }
  0x33   : > { %p911_p2 = pneg %p910_p1  ;;  %p917_p7 = por %p916_p6, %p915_p5 }
  0x35   : > { %p918_p10 = pnand %p917_p7, %p911_p2 }
  0x37   : > { %921 = shalt.err (!%p918_p10)
}
  0x38   : > { %790 = dma.hbm_to_vmem [thread:$0]  (!%p1181_p0), %s215_s24, 128, %s218_s26, %s206_s19  }
  0x39   : > { %s247_s1 = scalar_lea.vmem [#allocation10], %s1174_s6  ;;  %s1070_s25 = smov [#allocation10]  }
  0x3a   : > { %s255_s11 = sshll.u32 %s247_s1, 4  ;;  %s940_s10 = sshll.u32 %s1070_s25, 4  ;;  %s256_s11 = int_to_ptr.vmem [resolvable:$true] %s255_s11  ;;  %s941_s10 = int_to_ptr.vmem [resolvable:$false] %s940_s10 }
  0x3b   : > { %s935_s13 = scalar_lea.vmem %s256_s11, 128  ;;  %s942_s17 = scalar_lea.vmem %s941_s10, 256 }
  0x3c   : > { %p936_p13 = scmp.ne.s32.totalorder %s256_s11, %s935_s13  ;;  %p943_p2 = scmp.lt.s32.totalorder %s256_s11, %s941_s10 }
  0x3d   : > { %p944_p5 = scmp.lt.s32.totalorder %s942_s17, %s935_s13 }
  0x3e   : > { %p938_p12 = pnand %p936_p13, %p868_p3 }
  0x3f   : > { %p945_p6 = por %p944_p5, %p943_p2 }
  0x40   : > { %p939_p1 = pneg %p938_p12 }
  0x42   : > { %p946_p7 = pnand %p945_p6, %p939_p1 }
  0x44   : > { %949 = shalt.err (!%p946_p7)
}
  0x45   : > { %796 = dma.hbm_to_vmem [thread:$0]  (!%p1181_p0), %s253_s23, 128, %s256_s11, %s1193_s22  }
  0x46   : > { %s273_s12 = scalar_lea.hbm %s1334_s3, %s1177_s7  ;;  %s266_s14 = scalar_lea.vmem [#allocation11], %s1174_s6 }
  0x47   : > { %s275_s1 = sshll.u32 %s266_s14, 4  ;;  %s263_s13 = scalar_lea.sflag [#allocation12], %s1171_s5  ;;  %s276_s1 = int_to_ptr.vmem [resolvable:$true] %s275_s1 }
  0x48   : > { %s963_s25 = scalar_lea.vmem %s276_s1, 128  ;;  %s1071_s10 = smov [#allocation11]  }
  0x49   : > { %p964_p10 = scmp.ne.s32.totalorder %s276_s1, %s963_s25  ;;  %s968_s17 = sshll.u32 %s1071_s10, 4  ;;  %s969_s17 = int_to_ptr.vmem [resolvable:$false] %s968_s17 }
  0x4a   : > { %s970_s19 = scalar_lea.vmem %s969_s17, 256  ;;  %p971_p1 = scmp.lt.s32.totalorder %s276_s1, %s969_s17 }
  0x4b   : > { %p966_p13 = pnand %p964_p10, %p868_p3  ;;  %p972_p2 = scmp.lt.s32.totalorder %s970_s19, %s963_s25 }
  0x4d   : > { %p967_p12 = pneg %p966_p13  ;;  %p973_p5 = por %p972_p2, %p971_p1 }
  0x4f   : > { %p974_p6 = pnand %p973_p5, %p967_p12 }
  0x51   : > { %977 = shalt.err (!%p974_p6)
}
  0x52   : > { %799 = dma.hbm_to_vmem [thread:$0]  (!%p1181_p0), %s273_s12, 128, %s276_s1, %s263_s13  }
  0x53   : > { %284 = sbr.rel (%p1207_p4) target bundleno = 881 (0x371), region = 36  ;;  %s1252_s23 = sand.u32 (!%p1207_p4), 1, %s1050_s16  }
  0x54   : > { %s1255_s5 = sshll.u32 (!%p1207_p4), %s1252_s23, 3  ;;  %s287_s6 = scalar_lea.sflag (!%p1207_p4), [#allocation6], %s1252_s23 }
  0x55   : > { %s290_s7 = scalar_lea.vmem (!%p1207_p4), [#allocation5], %s1255_s5 }
  0x58   : > { %1029 = dma.done.wait (%p1153_p8), %s287_s6, 128  }
  0x59   : > { %1031 = vsyncadd (%p1153_p8), %s287_s6, 4294967168  ;;  %s295_s8 = sand.u32 1, %s1133_s21   ;;  %s299_s9 = scalar_lea.vmem [#allocation8], %s1255_s5 }
  0x5a   : > { %s296_s22 = scalar_lea.sflag [#allocation9], %s295_s8 }
  0x5b   : > { %1033 = dma.done.wait (%p1153_p8), %s296_s22, 256  }
  0x5c   : > { %1035 = vsyncadd (%p1153_p8), %s296_s22, 4294967040  ;;  %s308_s11 = scalar_lea.vmem [#allocation10], %s1255_s5  ;;  %s314_s29 = scalar_lea.sflag [#allocation12], %s1252_s23 }
  0x5d   : > { %s317_s24 = scalar_lea.vmem [#allocation11], %s1255_s5 }
  0x5e   : > { %1037 = dma.done.wait (%p1153_p8), %s314_s29, 128  }
  0x5f   : > { %1039 = vsyncadd (%p1153_p8), %s314_s29, 4294967168  ;;  %vm364_vm0 = vcmask 261120   ;;  %v1072_v0 = vmov 0.0   ;;  %vm1073_vm1 = vmmov 0   ;;  %v368_v1 = vld [vmem:[%s299_s9] sm:$0xff]  ;;  %v366_v2 = vld [vmem:[%s290_s7] sm:$0xff] }
  0x60   : > { %767 = vmatprep.subr.mxu0 %v1072_v0  ;;  %365 = vst.msk [vmem:[#allocation4] sm:$0xff] %vm364_vm0, %v1072_v0  ;;  %769 = vmatprep.mubr.msk.f32.mxu0 %vm1073_vm1, %v1072_v0  ;;  %v367_v3 = vmul.f32 0.17677669, %v366_v2  ;;  %vm361_vm2 = vcmask 7168   ;;  %v1074_v4 = vmov -inf   ;;  %v447_v5 = vld [vmem:[%s317_s24] sm:$0xff] }
  0x61   : > { %772 = vmatprep.subr.mxu1 %v1072_v0  ;;  %774 = vmatprep.mubr.msk.f32.mxu1 %vm1073_vm1, %v1072_v0  ;;  %362 = vst.msk [vmem:[#allocation2] sm:$0xff] %vm361_vm2, %v1074_v4  ;;  %363 = vst.msk [vmem:[#allocation3] sm:$0xff] %vm361_vm2, %v1072_v0  ;;  %vm450_vm3 = vcmask 64512   ;;  %v1075_v10 = vmov 0   ;;  %v369_v15 = vld [vmem:[%s308_s11] sm:$0xff]  ;;  %s760_s21 = sshll.u32 %s1058_s18, 7 }
  0x62   : > { %768 = vmatpush3.xpose.msk.msra.mxu0 %vm364_vm0, %v368_v1  ;;  %858 = vset.pattern.permute.xlu0 %v1075_v10  ;;  %s356_s27 = scalar_lea.vmem [#allocation13], %s1255_s5  ;;  %s583_s1 = scalar_lea.hbm %s1335_s4, %s760_s21 }
  0x63   : > { %859 = vset.pattern.permute.xlu1 %v1075_v10  ;;  %773 = vmatpush3.msra.mxu1 %v369_v15  ;;  %s585_s26 = sshll.u32 %s356_s27, 4  ;;  %s571_s13 = scalar_lea.sflag [#allocation7], %s1252_s23  ;;  %s586_s26 = int_to_ptr.vmem [resolvable:$true] %s585_s26 }
  0x64   : > { %s978_s25 = scalar_lea.vmem %s586_s26, 128  ;;  %s1076_s10 = smov [#allocation13]  }
  0x65   : > { %770 = vmatmul.mubr.msk.f32.vlgmr.msra.gmra.mxu0 %vm364_vm0, %v367_v3  ;;  %p979_p8 = scmp.ne.s32.totalorder %s586_s26, %s978_s25  ;;  %s982_s18 = sshll.u32 %s1076_s10, 4  ;;  %s983_s18 = int_to_ptr.vmem [resolvable:$false] %s982_s18 }
  0x66   : > { %s984_s17 = scalar_lea.vmem %s983_s18, 256  ;;  %p985_p4 = scmp.lt.s32.totalorder %s586_s26, %s983_s18 }
  0x67   : > { %v474_v29 = vld [vmem:[#allocation4] sm:$0xff]  ;;  %p980_p0 = pnand %p979_p8, %p1157_p9  ;;  %p986_p7 = scmp.lt.s32.totalorder %s984_s17, %s978_s25 }
  0x68   : > { %v449_v11 = vld [vmem:[#allocation2] sm:$0xff]  ;;  %v466_v23 = vld [vmem:[#allocation3] sm:$0xff] }
  0x69   : > { %p981_p3 = pneg %p980_p0  ;;  %p987_p10 = por %p986_p7, %p985_p4 }
  0x6b   : > { %p988_p13 = pnand %p987_p10, %p981_p3 }
 0x125   : > { %v443_v6 = vpop.f32.mrf.mxu0 }
 0x126   : > { %v448_v7 = vmul.f32 %v447_v5, %v443_v6 }
 0x127   : > { %v771_v8 = vpop.f32.mrf.mxu0 }
 0x128   : > { %v451_v9 = vsel %vm450_vm3, %v448_v7, -inf }
 0x129   : > { %452 = vmax.xlane.f32.xlu0 %v451_v9 }
 0x1b2   : > { %v453_v12 = vpop.xlane.xlu0 %452 }
 0x1b3   : > { %v454_v13 = vmax.f32 %v449_v11, %v453_v12 }
 0x1b5   : > { %v455_v14 = vsub.f32 %v449_v11, %v454_v13  ;;  %556 = vst.msk [vmem:[#allocation2] sm:$0xff] %vm361_vm2, %v454_v13  ;;  %460 = vperm.xlu0 %858, %v454_v13  }
 0x1b7   : > { %v456_v20 = vmul.f32 1.442695, %v455_v14 }
 0x230   : > { %v461_v16 = vpop.permute.xlu0 %460 }
 0x231   : > { %v463_v17 = vsub.f32 %v448_v7, %v461_v16 }
 0x233   : > { %v464_v18 = vmul.f32 1.442695, %v463_v17 }
 0x235   : > { %860 = vpow2.f32 %v464_v18 }
 0x236   : > { %862 = vpow2.f32 %v456_v20 }
 0x242   : > { %v861_v19 = vpop.eup %860 }
 0x243   : > { %775 = vmatmul.mubr.msk.f32.vlgmr.msra.gmra.mxu1 %vm450_vm3, %v861_v19  ;;  %v468_v21 = vsel %vm450_vm3, %v861_v19, 0.0  ;;  %v863_v22 = vpop.eup %862 }
 0x244   : > { %469 = vadd.xlane.f32.xlu1 %v468_v21  ;;  %v467_v24 = vmul.f32 %v863_v22, %v466_v23 }
 0x255   : > { %477 = vperm.xlu1 %859, %v863_v22  }
 0x2cd   : > { %v470_v25 = vpop.xlane.xlu1 %469 }
 0x2ce   : > { %v471_v26 = vadd.f32 %v470_v25, %v467_v24 }
 0x2d0   : > { %473 = vst.msk [vmem:[#allocation3] sm:$0xff] %vm361_vm2, %v471_v26 }
 0x2d1   : > { %v478_v30 = vpop.permute.xlu1 %477 }
 0x2d2   : > { %v480_v31 = vmul.f32 %v478_v30, %v474_v29 }
 0x2d7   : > { %v561_v27 = vld [vmem:[#allocation3] sm:$0xff] }
 0x2d8   : > { %864 = vrcp.f32 %v561_v27 }
 0x2e5   : > { %v865_v28 = vpop.eup %864 }
 0x2e6   : > { %565 = vperm.xlu1 %859, %v865_v28  }
 0x303   : > { %v550_v32 = vpop.f32.mrf.mxu1 }
 0x304   : > { %v554_v33 = vadd.f32 %v550_v32, %v480_v31 }
 0x305   : > { %v776_v34 = vpop.f32.mrf.mxu1 }
 0x306   : > { %555 = vst.msk [vmem:[#allocation4] sm:$0xff] %vm364_vm0, %v554_v33 }
 0x30d   : > { %v560_v35 = vld [vmem:[#allocation4] sm:$0xff] }
 0x361   : > { %v566_v36 = vpop.permute.xlu1 %565 }
 0x362   : > { %v568_v37 = vmul.f32 %v566_v36, %v560_v35 }
 0x364   : > { %569 = vst.msk [vmem:[%s356_s27] sm:$0xff] %vm364_vm0, %v568_v37 }
 0x365   : > { %991 = shalt.err (!%p988_p13)
}
 0x366   : > { %s992_s19 = scalar_lea.hbm %s583_s1, 128  ;;  %s996_s6 = scalar_lea.hbm %s1335_s4, 256 }
 0x367   : > { %p993_p12 = scmp.ne.s32.totalorder %s583_s1, %s992_s19  ;;  %p997_p5 = scmp.lt.s32.totalorder %s583_s1, %s1335_s4 }
 0x368   : > { %p998_p6 = scmp.lt.s32.totalorder %s996_s6, %s992_s19 }
 0x369   : > { %p994_p1 = pnand %p993_p12, %p1157_p9 }
 0x36a   : > { %p999_p8 = por %p998_p6, %p997_p5 }
 0x36b   : > { %p995_p2 = pneg %p994_p1 }
 0x36d   : > { %p1000_p0 = pnand %p999_p8, %p995_p2 }
 0x36f   : > { %1003 = shalt.err (!%p1000_p0)
}
 0x370   : > { %785 = dma.vmem_to_hbm [thread:$0]  (%p1157_p9), %s586_s26, 128, %s583_s1, %s571_s13  }
 0x371 PF: > { %s597_s22 = sand.u32 1, %s1046_s15   ;;  %p1351_p3 = scmp.ge.s32.totalorder %s1066_s20, 2 }
 0x372   : > { %s598_s9 = scalar_lea.sflag [#allocation7], %s597_s22 }
 0x373   : > { %p801_p4 = pnand %p1351_p3, %p1164_p11 }
 0x375   : > { %p802_p7 = pneg %p801_p4 }
 0x377   : > { %1041 = dma.done.wait (%p802_p7), %s598_s9, 128  }
 0x378   : > { %1043 = vsyncadd (%p802_p7), %s598_s9, 4294967168  ;;  %s26_s20 = sadd.s32 1, %s1066_s20   ;;  %s1352_s11 = sld [smem:[#allocation18_spill]] }
 0x379   : > { %p23_p10 = scmp.ge.s32.totalorder %s26_s20, 4   ;;  %s1353_s17 = sld [smem:[#allocation21_spill]] }
 0x37a   : > { %s1354_s18 = sld [smem:[#allocation19_spill]]  ;;  %s1356_s15 = smov %s1050_s16 }
 0x37b   : > { %s1355_s19 = sld [smem:[#allocation20_spill]]  ;;  %25 = sbr.rel (!%p23_p10) target bundleno = 12 (0xc), region = 126 }
 0x37e   : > { %s1357_s16 = smov %s1352_s11 }
 0x380   :  { %603 = vsyncpa [#allocation6], 1 }
 0x381   :  { %605 = vsyncpa [#allocation6 + $0x1], 1 }
 0x382   :  { %606 = vsyncpa [#allocation9], 1 }
 0x383   :  { %608 = vsyncpa [#allocation9 + $0x1], 1 }
 0x384   :  { %609 = vsyncpa [#allocation12], 1 }
 0x385   :  { %611 = vsyncpa [#allocation12 + $0x1], 1 }
 0x386   :  { %612 = vsyncpa [#allocation7], 1 }
 0x387   :  { %614 = vsyncpa [#allocation7 + $0x1], 1 }

</bundles_post_ra>
